<compile_context>
chip_gen: v5e
topology: v5e:2x2
jax: 0.10.0
libtpu: 0.0.40
codegen_flags: <defaults>
</compile_context>

<pallas_src>
import jax
import jax.numpy as jnp
from jax.experimental import pallas as pl
from jax.experimental.pallas import tpu as pltpu

EPS = 1e-5     # PyTorch nn.LayerNorm default eps
_LANE = 128


def _layernorm_t(hT, w_col=None, b_col=None):
    """LayerNorm over the feature axis (axis 0) in (features, batch) layout.

    hT: (d, TILE_B); optional affine w_col/b_col: (d, 1). Biased variance
    (PyTorch semantics). Uses sum * (1/d), reuses (h - mu); rsqrt -> EUP.
    """
    inv_d = 1.0 / hT.shape[0]
    mu = jnp.sum(hT, axis=0, keepdims=True) * inv_d           # (1, TB) sublane reduce
    xc = hT - mu
    var = jnp.sum(xc * xc, axis=0, keepdims=True) * inv_d     # (1, TB)
    out = xc * jax.lax.rsqrt(var + EPS)
    if w_col is not None:
        out = out * w_col + b_col
    return out


def resnet_kernel(
    xT_ref,               # (d_num_pad, TB) bf16  features on sublanes, batch on lanes
    wf_ref, bf_ref,       # (d, d_num_pad) bf16, (d, 1) f32
    w0_ref, b0_ref,       # (L, dh, d) bf16 (gamma folded), (L, dh, 1) f32 (beta folded)
    w1_ref, b1_ref,       # (L, d, dh) bf16, (L, d, 1) f32
    lnw_ref, lnb_ref,     # (d, 1) f32 x2         last LayerNorm affine
    whT_ref, bh_ref,      # (d, d_out) f32, (d_out, 1) f32
    o_ref,                # (d_out, TB) f32       lane-dense output slab
):
    # x = self.first_layer(x)   (computed transposed: h^T = W @ x^T + b)
    h = jnp.dot(wf_ref[...], xT_ref[...],
                preferred_element_type=jnp.float32) + bf_ref[...]

    n_layers = w0_ref.shape[0]
    for l in range(n_layers):  # static unroll; n_layers is small & compile-time
        # layer['norm']: gamma/beta folded into w0/b0 host-side -> no-affine LN.
        z = _layernorm_t(h).astype(jnp.bfloat16)
        z = jnp.dot(w0_ref[l], z, preferred_element_type=jnp.float32) + b0_ref[l]
        # main_activation (relu) fused with bf16 downcast feeding the w1 matmul.
        z = jnp.maximum(z, 0.0).astype(jnp.bfloat16)
        # hidden_dropout == 0.0 (eval) -> no-op
        z = jnp.dot(w1_ref[l], z, preferred_element_type=jnp.float32) + b1_ref[l]
        # residual_dropout == 0.0 (eval) -> no-op
        h = h + z                                             # residual add

    h = _layernorm_t(h, lnw_ref[...], lnb_ref[...])           # last_normalization
    h = jnp.maximum(h, 0.0)                                   # last_activation (relu)

    d_out = whT_ref.shape[1]
    if d_out == 1:
        # Head as VPU multiply + sublane reduce (avoids an N=1 MXU matmul);
        # produces the lane-dense (1, TILE_B) result directly.
        out = jnp.sum(h * whT_ref[...], axis=0, keepdims=True) + bh_ref[...]
    else:
        out = jax.lax.dot_general(whT_ref[...], h, (((0,), (0,)), ((), ())),
                                  preferred_element_type=jnp.float32) + bh_ref[...]
    o_ref[...] = out.astype(o_ref.dtype)


def resnet_forward(x_num, params, *, tile_b=8192):
    B, d_num = x_num.shape
    d_out = params["whT"].shape[1]

    # --- tiling ---------------------------------------------------------------
    d_num_pad = ((d_num + 7) // 8) * 8                 # pad first-layer K dim
    b_ceil = max(_LANE, ((B + _LANE - 1) // _LANE) * _LANE)
    tb = max(_LANE, (min(tile_b, b_ceil) // _LANE) * _LANE)
    # v7x has 2 TensorCores: keep >= 2 grid steps (when the batch allows) so the
    # "parallel" batch axis can be sharded across them. No effect for tiny B.
    if b_ceil >= 2 * _LANE and tb >= b_ceil:
        tb = max(_LANE, ((b_ceil // 2) // _LANE) * _LANE)
    B_pad = ((B + tb - 1) // tb) * tb
    n_tiles = B_pad // tb

    bf16 = jnp.bfloat16
    # --- host-side layout / dtype plumbing ------------------------------------
    # (batch, feat) -> (feat, batch), zero-pad, bf16 (halves per-tile input DMA).
    xT = jnp.pad(x_num, ((0, B_pad - B), (0, d_num_pad - d_num))).T.astype(bf16)
    wf = jnp.pad(params["wf"], ((0, 0), (0, d_num_pad - d_num))).astype(bf16)
    # Fold the per-layer LayerNorm affine into linear0 (exact):
    #   w0' = w0 * gamma,    b0' = b0 + w0 @ beta
    gamma, beta = params["nw"], params["nb"]            # (L, d) each
    w0 = (params["w0"] * gamma[:, None, :]).astype(bf16)
    b0 = params["b0"] + jnp.einsum("lhd,ld->lh", params["w0"], beta)[..., None]
    w1 = params["w1"].astype(bf16)

    args = (xT, wf, params["bf"], w0, b0, w1, params["b1"],
            params["lnw"], params["lnb"], params["whT"], params["bh"])

    def resident(shape):
        # Whole array as one block; constant index_map keeps it VMEM-resident
        # (no re-DMA) across the batch grid.
        return pl.BlockSpec(tuple(shape), lambda i, _nd=len(shape): (0,) * _nd)

    in_specs = [pl.BlockSpec((d_num_pad, tb), lambda i: (0, i))]
    in_specs += [resident(a.shape) for a in args[1:]]
    out_specs = pl.BlockSpec((d_out, tb), lambda i: (0, i))

    out = pl.pallas_call(
        resnet_kernel,
        out_shape=jax.ShapeDtypeStruct((d_out, B_pad), jnp.float32),
        grid=(n_tiles,),
        in_specs=in_specs,
        out_specs=out_specs,
        compiler_params=pltpu.CompilerParams(
            dimension_semantics=("parallel",),     # batch tiles are independent
            vmem_limit_bytes=32 * 1024 * 1024,     # explicit; fits v7x budget
        ),
    )(*args)

    out = out[:, :B].T                             # (B, d_out), drop batch padding
    # x = x.squeeze(-1)  (glue, outside the kernel)
    return out[:, 0] if d_out == 1 else out


def make_params(key, *, d_numerical, d, d_hidden, n_layers, d_out):
    ks = jax.random.split(key, 12)
    f32 = jnp.float32
    s = 0.1
    return {
        # Linear weights stored PyTorch-style (out_features, in_features):
        # inside the kernel  y^T = W @ x^T + b_col.
        "wf": s * jax.random.normal(ks[0], (d, d_numerical), f32),
        "bf": s * jax.random.normal(ks[1], (d, 1), f32),
        # LayerNorm affines are non-trivial here so the host-side fold is exercised.
        "nw": 1.0 + s * jax.random.normal(ks[2], (n_layers, d), f32),
        "nb": s * jax.random.normal(ks[3], (n_layers, d), f32),
        "w0": s * jax.random.normal(ks[4], (n_layers, d_hidden, d), f32),
        "b0": s * jax.random.normal(ks[5], (n_layers, d_hidden, 1), f32),
        "w1": s * jax.random.normal(ks[6], (n_layers, d, d_hidden), f32),
        "b1": s * jax.random.normal(ks[7], (n_layers, d, 1), f32),
        "lnw": 1.0 + s * jax.random.normal(ks[8], (d, 1), f32),
        "lnb": s * jax.random.normal(ks[9], (d, 1), f32),
        "whT": s * jax.random.normal(ks[10], (d, d_out), f32),   # head W^T
        "bh": s * jax.random.normal(ks[11], (d_out, 1), f32),
    }


def ref_forward(x, p):
    """Pure-JAX reference in PyTorch (batch, features) orientation. Mirrors the
    kernel's bf16-operand / f32-accumulate matmuls but applies the LayerNorm
    affine un-folded, exactly as the torch module does."""
    c = lambda a: a.astype(jnp.bfloat16)
    f32 = jnp.float32
    h = jnp.dot(c(x), c(p["wf"]).T, preferred_element_type=f32) + p["bf"][:, 0]
    for l in range(p["nw"].shape[0]):
        mu = h.mean(-1, keepdims=True)
        var = ((h - mu) ** 2).mean(-1, keepdims=True)
        z = (h - mu) * jax.lax.rsqrt(var + EPS) * p["nw"][l] + p["nb"][l]
        z = jnp.dot(c(z), c(p["w0"][l]).T, preferred_element_type=f32) + p["b0"][l, :, 0]
        z = jnp.maximum(z, 0.0)
        z = jnp.dot(c(z), c(p["w1"][l]).T, preferred_element_type=f32) + p["b1"][l, :, 0]
        h = h + z
    mu = h.mean(-1, keepdims=True)
    var = ((h - mu) ** 2).mean(-1, keepdims=True)
    h = (h - mu) * jax.lax.rsqrt(var + EPS) * p["lnw"][:, 0] + p["lnb"][:, 0]
    h = jnp.maximum(h, 0.0)
    out = h @ p["whT"] + p["bh"][:, 0]              # head in f32, like the kernel
    return out[:, 0] if out.shape[-1] == 1 else out


if __name__ == "__main__":
    # Module hyperparameters (small, consistent with the module defaults)
    d_numerical = 12
    d = 32
    d_hidden = int(d * 2.0)   # d_hidden_factor = 2.0
    n_layers = 3
    d_out = 1
    batch = 256               # -> two 128-wide batch tiles (exercises the grid)

    key = jax.random.PRNGKey(0)
    kx, kp = jax.random.split(key)
    x_num = jax.random.normal(kx, (batch, d_numerical), jnp.float32)
    params = make_params(kp, d_numerical=d_numerical, d=d,
                         d_hidden=d_hidden, n_layers=n_layers, d_out=d_out)

    y = jax.jit(resnet_forward)(x_num, params)
    jax.block_until_ready(y)
    assert y.shape == (batch,), y.shape

    y_ref = ref_forward(x_num, params)
    max_err = float(jnp.max(jnp.abs(y - y_ref)))
    assert jnp.allclose(y, y_ref, atol=2e-2, rtol=2e-2), max_err

    print("KERNEL_OK")
</pallas_src>

<mosaic_0001>
module attributes {stable_mosaic.version = 11 : i64} {
  func.func @resnet_kernel(%arg0: i32, %arg1: memref<16x128xbf16, #tpu.memory_space<vmem>>, %arg2: memref<32x16xbf16, #tpu.memory_space<vmem>>, %arg3: memref<32x1xf32, #tpu.memory_space<vmem>>, %arg4: memref<3x64x32xbf16, #tpu.memory_space<vmem>>, %arg5: memref<3x64x1xf32, #tpu.memory_space<vmem>>, %arg6: memref<3x32x64xbf16, #tpu.memory_space<vmem>>, %arg7: memref<3x32x1xf32, #tpu.memory_space<vmem>>, %arg8: memref<32x1xf32, #tpu.memory_space<vmem>>, %arg9: memref<32x1xf32, #tpu.memory_space<vmem>>, %arg10: memref<32x1xf32, #tpu.memory_space<vmem>>, %arg11: memref<1x1xf32, #tpu.memory_space<vmem>>, %arg12: memref<1x128xf32, #tpu.memory_space<vmem>>) attributes {dimension_semantics = [#tpu.dimension_semantics<parallel>], iteration_bounds = array<i64: 2>, scalar_prefetch = 0 : i64, scratch_operands = 0 : i64, tpu.core_type = #tpu.core_type<tc>, window_params = [{transform_indices = @transform_0, window_bounds = array<i64: 16, 128>}, {pipeline_mode = #tpu.pipeline_mode<synchronous>, transform_indices = @transform_1, window_bounds = array<i64: 32, 16>}, {pipeline_mode = #tpu.pipeline_mode<synchronous>, transform_indices = @transform_2, window_bounds = array<i64: 32, 1>}, {pipeline_mode = #tpu.pipeline_mode<synchronous>, transform_indices = @transform_3, window_bounds = array<i64: 3, 64, 32>}, {pipeline_mode = #tpu.pipeline_mode<synchronous>, transform_indices = @transform_4, window_bounds = array<i64: 3, 64, 1>}, {pipeline_mode = #tpu.pipeline_mode<synchronous>, transform_indices = @transform_5, window_bounds = array<i64: 3, 32, 64>}, {pipeline_mode = #tpu.pipeline_mode<synchronous>, transform_indices = @transform_6, window_bounds = array<i64: 3, 32, 1>}, {pipeline_mode = #tpu.pipeline_mode<synchronous>, transform_indices = @transform_7, window_bounds = array<i64: 32, 1>}, {pipeline_mode = #tpu.pipeline_mode<synchronous>, transform_indices = @transform_8, window_bounds = array<i64: 32, 1>}, {pipeline_mode = #tpu.pipeline_mode<synchronous>, transform_indices = @transform_9, window_bounds = array<i64: 32, 1>}, {pipeline_mode = #tpu.pipeline_mode<synchronous>, transform_indices = @transform_10, window_bounds = array<i64: 1, 1>}, {transform_indices = @transform_11, window_bounds = array<i64: 1, 128>}]} {
    %c0 = arith.constant 0 : index
    %c0_0 = arith.constant 0 : index
    %0 = vector.load %arg2[%c0, %c0_0] : memref<32x16xbf16, #tpu.memory_space<vmem>>, vector<32x16xbf16>
    %c0_1 = arith.constant 0 : index
    %c0_2 = arith.constant 0 : index
    %1 = vector.load %arg1[%c0_1, %c0_2] : memref<16x128xbf16, #tpu.memory_space<vmem>>, vector<16x128xbf16>
    %cst = arith.constant dense<0.000000e+00> : vector<32x128xf32>
    %2 = tpu.matmul %0, %1, %cst {dimension_numbers = #tpu.dot_dimension_numbers<[1], [0], [0], [1], [0, 0, 1, 1], [], []>} : vector<32x16xbf16>, vector<16x128xbf16>, vector<32x128xf32> -> vector<32x128xf32>
    %c0_3 = arith.constant 0 : index
    %c0_4 = arith.constant 0 : index
    %3 = vector.load %arg3[%c0_3, %c0_4] : memref<32x1xf32, #tpu.memory_space<vmem>>, vector<32x1xf32>
    %4 = vector.broadcast %3 : vector<32x1xf32> to vector<32x128xf32>
    %5 = arith.addf %2, %4 : vector<32x128xf32>
    %cst_5 = arith.constant dense<0.000000e+00> : vector<128xf32>
    %6 = vector.multi_reduction <add>, %5, %cst_5 [0] : vector<32x128xf32> to vector<128xf32>
    %7 = vector.shape_cast %6 : vector<128xf32> to vector<1x128xf32>
    %cst_6 = arith.constant 3.125000e-02 : f32
    %8 = vector.broadcast %cst_6 : f32 to vector<1x128xf32>
    %9 = arith.mulf %7, %8 : vector<1x128xf32>
    %10 = vector.broadcast %9 : vector<1x128xf32> to vector<32x128xf32>
    %11 = arith.subf %5, %10 : vector<32x128xf32>
    %12 = arith.mulf %11, %11 : vector<32x128xf32>
    %cst_7 = arith.constant dense<0.000000e+00> : vector<128xf32>
    %13 = vector.multi_reduction <add>, %12, %cst_7 [0] : vector<32x128xf32> to vector<128xf32>
    %14 = vector.shape_cast %13 : vector<128xf32> to vector<1x128xf32>
    %cst_8 = arith.constant 3.125000e-02 : f32
    %15 = vector.broadcast %cst_8 : f32 to vector<1x128xf32>
    %16 = arith.mulf %14, %15 : vector<1x128xf32>
    %cst_9 = arith.constant 9.99999974E-6 : f32
    %17 = vector.broadcast %cst_9 : f32 to vector<1x128xf32>
    %18 = arith.addf %16, %17 : vector<1x128xf32>
    %19 = math.rsqrt %18 : vector<1x128xf32>
    %20 = vector.broadcast %19 : vector<1x128xf32> to vector<32x128xf32>
    %21 = arith.mulf %11, %20 : vector<32x128xf32>
    %22 = arith.truncf %21 : vector<32x128xf32> to vector<32x128xbf16>
    %c0_10 = arith.constant 0 : index
    %c0_11 = arith.constant 0 : index
    %c0_12 = arith.constant 0 : index
    %23 = vector.load %arg4[%c0_10, %c0_11, %c0_12] : memref<3x64x32xbf16, #tpu.memory_space<vmem>>, vector<1x64x32xbf16>
    %24 = vector.shape_cast %23 : vector<1x64x32xbf16> to vector<64x32xbf16>
    %cst_13 = arith.constant dense<0.000000e+00> : vector<64x128xf32>
    %25 = tpu.matmul %24, %22, %cst_13 {dimension_numbers = #tpu.dot_dimension_numbers<[1], [0], [0], [1], [0, 0, 1, 1], [], []>} : vector<64x32xbf16>, vector<32x128xbf16>, vector<64x128xf32> -> vector<64x128xf32>
    %c0_14 = arith.constant 0 : index
    %c0_15 = arith.constant 0 : index
    %c0_16 = arith.constant 0 : index
    %26 = vector.load %arg5[%c0_14, %c0_15, %c0_16] : memref<3x64x1xf32, #tpu.memory_space<vmem>>, vector<1x64x1xf32>
    %27 = vector.shape_cast %26 : vector<1x64x1xf32> to vector<64x1xf32>
    %28 = vector.broadcast %27 : vector<64x1xf32> to vector<64x128xf32>
    %29 = arith.addf %25, %28 : vector<64x128xf32>
    %cst_17 = arith.constant 0.000000e+00 : f32
    %30 = vector.broadcast %cst_17 : f32 to vector<64x128xf32>
    %31 = arith.maximumf %29, %30 : vector<64x128xf32>
    %32 = arith.truncf %31 : vector<64x128xf32> to vector<64x128xbf16>
    %c0_18 = arith.constant 0 : index
    %c0_19 = arith.constant 0 : index
    %c0_20 = arith.constant 0 : index
    %33 = vector.load %arg6[%c0_18, %c0_19, %c0_20] : memref<3x32x64xbf16, #tpu.memory_space<vmem>>, vector<1x32x64xbf16>
    %34 = vector.shape_cast %33 : vector<1x32x64xbf16> to vector<32x64xbf16>
    %cst_21 = arith.constant dense<0.000000e+00> : vector<32x128xf32>
    %35 = tpu.matmul %34, %32, %cst_21 {dimension_numbers = #tpu.dot_dimension_numbers<[1], [0], [0], [1], [0, 0, 1, 1], [], []>} : vector<32x64xbf16>, vector<64x128xbf16>, vector<32x128xf32> -> vector<32x128xf32>
    %c0_22 = arith.constant 0 : index
    %c0_23 = arith.constant 0 : index
    %c0_24 = arith.constant 0 : index
    %36 = vector.load %arg7[%c0_22, %c0_23, %c0_24] : memref<3x32x1xf32, #tpu.memory_space<vmem>>, vector<1x32x1xf32>
    %37 = vector.shape_cast %36 : vector<1x32x1xf32> to vector<32x1xf32>
    %38 = vector.broadcast %37 : vector<32x1xf32> to vector<32x128xf32>
    %39 = arith.addf %35, %38 : vector<32x128xf32>
    %40 = arith.addf %5, %39 : vector<32x128xf32>
    %cst_25 = arith.constant dense<0.000000e+00> : vector<128xf32>
    %41 = vector.multi_reduction <add>, %40, %cst_25 [0] : vector<32x128xf32> to vector<128xf32>
    %42 = vector.shape_cast %41 : vector<128xf32> to vector<1x128xf32>
    %cst_26 = arith.constant 3.125000e-02 : f32
    %43 = vector.broadcast %cst_26 : f32 to vector<1x128xf32>
    %44 = arith.mulf %42, %43 : vector<1x128xf32>
    %45 = vector.broadcast %44 : vector<1x128xf32> to vector<32x128xf32>
    %46 = arith.subf %40, %45 : vector<32x128xf32>
    %47 = arith.mulf %46, %46 : vector<32x128xf32>
    %cst_27 = arith.constant dense<0.000000e+00> : vector<128xf32>
    %48 = vector.multi_reduction <add>, %47, %cst_27 [0] : vector<32x128xf32> to vector<128xf32>
    %49 = vector.shape_cast %48 : vector<128xf32> to vector<1x128xf32>
    %cst_28 = arith.constant 3.125000e-02 : f32
    %50 = vector.broadcast %cst_28 : f32 to vector<1x128xf32>
    %51 = arith.mulf %49, %50 : vector<1x128xf32>
    %cst_29 = arith.constant 9.99999974E-6 : f32
    %52 = vector.broadcast %cst_29 : f32 to vector<1x128xf32>
    %53 = arith.addf %51, %52 : vector<1x128xf32>
    %54 = math.rsqrt %53 : vector<1x128xf32>
    %55 = vector.broadcast %54 : vector<1x128xf32> to vector<32x128xf32>
    %56 = arith.mulf %46, %55 : vector<32x128xf32>
    %57 = arith.truncf %56 : vector<32x128xf32> to vector<32x128xbf16>
    %c1 = arith.constant 1 : index
    %c0_30 = arith.constant 0 : index
    %c0_31 = arith.constant 0 : index
    %58 = vector.load %arg4[%c1, %c0_30, %c0_31] : memref<3x64x32xbf16, #tpu.memory_space<vmem>>, vector<1x64x32xbf16>
    %59 = vector.shape_cast %58 : vector<1x64x32xbf16> to vector<64x32xbf16>
    %cst_32 = arith.constant dense<0.000000e+00> : vector<64x128xf32>
    %60 = tpu.matmul %59, %57, %cst_32 {dimension_numbers = #tpu.dot_dimension_numbers<[1], [0], [0], [1], [0, 0, 1, 1], [], []>} : vector<64x32xbf16>, vector<32x128xbf16>, vector<64x128xf32> -> vector<64x128xf32>
    %c1_33 = arith.constant 1 : index
    %c0_34 = arith.constant 0 : index
    %c0_35 = arith.constant 0 : index
    %61 = vector.load %arg5[%c1_33, %c0_34, %c0_35] : memref<3x64x1xf32, #tpu.memory_space<vmem>>, vector<1x64x1xf32>
    %62 = vector.shape_cast %61 : vector<1x64x1xf32> to vector<64x1xf32>
    %63 = vector.broadcast %62 : vector<64x1xf32> to vector<64x128xf32>
    %64 = arith.addf %60, %63 : vector<64x128xf32>
    %cst_36 = arith.constant 0.000000e+00 : f32
    %65 = vector.broadcast %cst_36 : f32 to vector<64x128xf32>
    %66 = arith.maximumf %64, %65 : vector<64x128xf32>
    %67 = arith.truncf %66 : vector<64x128xf32> to vector<64x128xbf16>
    %c1_37 = arith.constant 1 : index
    %c0_38 = arith.constant 0 : index
    %c0_39 = arith.constant 0 : index
    %68 = vector.load %arg6[%c1_37, %c0_38, %c0_39] : memref<3x32x64xbf16, #tpu.memory_space<vmem>>, vector<1x32x64xbf16>
    %69 = vector.shape_cast %68 : vector<1x32x64xbf16> to vector<32x64xbf16>
    %cst_40 = arith.constant dense<0.000000e+00> : vector<32x128xf32>
    %70 = tpu.matmul %69, %67, %cst_40 {dimension_numbers = #tpu.dot_dimension_numbers<[1], [0], [0], [1], [0, 0, 1, 1], [], []>} : vector<32x64xbf16>, vector<64x128xbf16>, vector<32x128xf32> -> vector<32x128xf32>
    %c1_41 = arith.constant 1 : index
    %c0_42 = arith.constant 0 : index
    %c0_43 = arith.constant 0 : index
    %71 = vector.load %arg7[%c1_41, %c0_42, %c0_43] : memref<3x32x1xf32, #tpu.memory_space<vmem>>, vector<1x32x1xf32>
    %72 = vector.shape_cast %71 : vector<1x32x1xf32> to vector<32x1xf32>
    %73 = vector.broadcast %72 : vector<32x1xf32> to vector<32x128xf32>
    %74 = arith.addf %70, %73 : vector<32x128xf32>
    %75 = arith.addf %40, %74 : vector<32x128xf32>
    %cst_44 = arith.constant dense<0.000000e+00> : vector<128xf32>
    %76 = vector.multi_reduction <add>, %75, %cst_44 [0] : vector<32x128xf32> to vector<128xf32>
    %77 = vector.shape_cast %76 : vector<128xf32> to vector<1x128xf32>
    %cst_45 = arith.constant 3.125000e-02 : f32
    %78 = vector.broadcast %cst_45 : f32 to vector<1x128xf32>
    %79 = arith.mulf %77, %78 : vector<1x128xf32>
    %80 = vector.broadcast %79 : vector<1x128xf32> to vector<32x128xf32>
    %81 = arith.subf %75, %80 : vector<32x128xf32>
    %82 = arith.mulf %81, %81 : vector<32x128xf32>
    %cst_46 = arith.constant dense<0.000000e+00> : vector<128xf32>
    %83 = vector.multi_reduction <add>, %82, %cst_46 [0] : vector<32x128xf32> to vector<128xf32>
    %84 = vector.shape_cast %83 : vector<128xf32> to vector<1x128xf32>
    %cst_47 = arith.constant 3.125000e-02 : f32
    %85 = vector.broadcast %cst_47 : f32 to vector<1x128xf32>
    %86 = arith.mulf %84, %85 : vector<1x128xf32>
    %cst_48 = arith.constant 9.99999974E-6 : f32
    %87 = vector.broadcast %cst_48 : f32 to vector<1x128xf32>
    %88 = arith.addf %86, %87 : vector<1x128xf32>
    %89 = math.rsqrt %88 : vector<1x128xf32>
    %90 = vector.broadcast %89 : vector<1x128xf32> to vector<32x128xf32>
    %91 = arith.mulf %81, %90 : vector<32x128xf32>
    %92 = arith.truncf %91 : vector<32x128xf32> to vector<32x128xbf16>
    %c2 = arith.constant 2 : index
    %c0_49 = arith.constant 0 : index
    %c0_50 = arith.constant 0 : index
    %93 = vector.load %arg4[%c2, %c0_49, %c0_50] : memref<3x64x32xbf16, #tpu.memory_space<vmem>>, vector<1x64x32xbf16>
    %94 = vector.shape_cast %93 : vector<1x64x32xbf16> to vector<64x32xbf16>
    %cst_51 = arith.constant dense<0.000000e+00> : vector<64x128xf32>
    %95 = tpu.matmul %94, %92, %cst_51 {dimension_numbers = #tpu.dot_dimension_numbers<[1], [0], [0], [1], [0, 0, 1, 1], [], []>} : vector<64x32xbf16>, vector<32x128xbf16>, vector<64x128xf32> -> vector<64x128xf32>
    %c2_52 = arith.constant 2 : index
    %c0_53 = arith.constant 0 : index
    %c0_54 = arith.constant 0 : index
    %96 = vector.load %arg5[%c2_52, %c0_53, %c0_54] : memref<3x64x1xf32, #tpu.memory_space<vmem>>, vector<1x64x1xf32>
    %97 = vector.shape_cast %96 : vector<1x64x1xf32> to vector<64x1xf32>
    %98 = vector.broadcast %97 : vector<64x1xf32> to vector<64x128xf32>
    %99 = arith.addf %95, %98 : vector<64x128xf32>
    %cst_55 = arith.constant 0.000000e+00 : f32
    %100 = vector.broadcast %cst_55 : f32 to vector<64x128xf32>
    %101 = arith.maximumf %99, %100 : vector<64x128xf32>
    %102 = arith.truncf %101 : vector<64x128xf32> to vector<64x128xbf16>
    %c2_56 = arith.constant 2 : index
    %c0_57 = arith.constant 0 : index
    %c0_58 = arith.constant 0 : index
    %103 = vector.load %arg6[%c2_56, %c0_57, %c0_58] : memref<3x32x64xbf16, #tpu.memory_space<vmem>>, vector<1x32x64xbf16>
    %104 = vector.shape_cast %103 : vector<1x32x64xbf16> to vector<32x64xbf16>
    %cst_59 = arith.constant dense<0.000000e+00> : vector<32x128xf32>
    %105 = tpu.matmul %104, %102, %cst_59 {dimension_numbers = #tpu.dot_dimension_numbers<[1], [0], [0], [1], [0, 0, 1, 1], [], []>} : vector<32x64xbf16>, vector<64x128xbf16>, vector<32x128xf32> -> vector<32x128xf32>
    %c2_60 = arith.constant 2 : index
    %c0_61 = arith.constant 0 : index
    %c0_62 = arith.constant 0 : index
    %106 = vector.load %arg7[%c2_60, %c0_61, %c0_62] : memref<3x32x1xf32, #tpu.memory_space<vmem>>, vector<1x32x1xf32>
    %107 = vector.shape_cast %106 : vector<1x32x1xf32> to vector<32x1xf32>
    %108 = vector.broadcast %107 : vector<32x1xf32> to vector<32x128xf32>
    %109 = arith.addf %105, %108 : vector<32x128xf32>
    %110 = arith.addf %75, %109 : vector<32x128xf32>
    %c0_63 = arith.constant 0 : index
    %c0_64 = arith.constant 0 : index
    %111 = vector.load %arg8[%c0_63, %c0_64] : memref<32x1xf32, #tpu.memory_space<vmem>>, vector<32x1xf32>
    %c0_65 = arith.constant 0 : index
    %c0_66 = arith.constant 0 : index
    %112 = vector.load %arg9[%c0_65, %c0_66] : memref<32x1xf32, #tpu.memory_space<vmem>>, vector<32x1xf32>
    %cst_67 = arith.constant dense<0.000000e+00> : vector<128xf32>
    %113 = vector.multi_reduction <add>, %110, %cst_67 [0] : vector<32x128xf32> to vector<128xf32>
    %114 = vector.shape_cast %113 : vector<128xf32> to vector<1x128xf32>
    %cst_68 = arith.constant 3.125000e-02 : f32
    %115 = vector.broadcast %cst_68 : f32 to vector<1x128xf32>
    %116 = arith.mulf %114, %115 : vector<1x128xf32>
    %117 = vector.broadcast %116 : vector<1x128xf32> to vector<32x128xf32>
    %118 = arith.subf %110, %117 : vector<32x128xf32>
    %119 = arith.mulf %118, %118 : vector<32x128xf32>
    %cst_69 = arith.constant dense<0.000000e+00> : vector<128xf32>
    %120 = vector.multi_reduction <add>, %119, %cst_69 [0] : vector<32x128xf32> to vector<128xf32>
    %121 = vector.shape_cast %120 : vector<128xf32> to vector<1x128xf32>
    %cst_70 = arith.constant 3.125000e-02 : f32
    %122 = vector.broadcast %cst_70 : f32 to vector<1x128xf32>
    %123 = arith.mulf %121, %122 : vector<1x128xf32>
    %cst_71 = arith.constant 9.99999974E-6 : f32
    %124 = vector.broadcast %cst_71 : f32 to vector<1x128xf32>
    %125 = arith.addf %123, %124 : vector<1x128xf32>
    %126 = math.rsqrt %125 : vector<1x128xf32>
    %127 = vector.broadcast %126 : vector<1x128xf32> to vector<32x128xf32>
    %128 = arith.mulf %118, %127 : vector<32x128xf32>
    %129 = vector.broadcast %111 : vector<32x1xf32> to vector<32x128xf32>
    %130 = arith.mulf %128, %129 : vector<32x128xf32>
    %131 = vector.broadcast %112 : vector<32x1xf32> to vector<32x128xf32>
    %132 = arith.addf %130, %131 : vector<32x128xf32>
    %cst_72 = arith.constant 0.000000e+00 : f32
    %133 = vector.broadcast %cst_72 : f32 to vector<32x128xf32>
    %134 = arith.maximumf %132, %133 : vector<32x128xf32>
    %c0_73 = arith.constant 0 : index
    %c0_74 = arith.constant 0 : index
    %135 = vector.load %arg10[%c0_73, %c0_74] : memref<32x1xf32, #tpu.memory_space<vmem>>, vector<32x1xf32>
    %136 = vector.broadcast %135 : vector<32x1xf32> to vector<32x128xf32>
    %137 = arith.mulf %134, %136 : vector<32x128xf32>
    %cst_75 = arith.constant dense<0.000000e+00> : vector<128xf32>
    %138 = vector.multi_reduction <add>, %137, %cst_75 [0] : vector<32x128xf32> to vector<128xf32>
    %139 = vector.shape_cast %138 : vector<128xf32> to vector<1x128xf32>
    %c0_76 = arith.constant 0 : index
    %c0_77 = arith.constant 0 : index
    %140 = vector.load %arg11[%c0_76, %c0_77] : memref<1x1xf32, #tpu.memory_space<vmem>>, vector<1x1xf32>
    %141 = vector.broadcast %140 : vector<1x1xf32> to vector<1x128xf32>
    %142 = arith.addf %139, %141 : vector<1x128xf32>
    %c0_78 = arith.constant 0 : index
    %c0_79 = arith.constant 0 : index
    %143 = vector.load %arg12[%c0_78, %c0_79] : memref<1x128xf32, #tpu.memory_space<vmem>>, vector<1x128xf32>
    tpu.vector_store %arg12[%c0_78, %c0_79], %142 {strides = array<i32>} : memref<1x128xf32, #tpu.memory_space<vmem>>, vector<1x128xf32>,
    return
  }
  func.func @transform_0(%arg0: i32) -> (i32, i32) {
    %c0_i32 = arith.constant 0 : i32
    %c0_i32_0 = arith.constant 0 : i32
    return %c0_i32, %arg0 : i32, i32
  }
  func.func @transform_1(%arg0: i32) -> (i32, i32) {
    %c0_i32 = arith.constant 0 : i32
    %c0_i32_0 = arith.constant 0 : i32
    %c0_i32_1 = arith.constant 0 : i32
    return %c0_i32, %c0_i32_0 : i32, i32
  }
  func.func @transform_2(%arg0: i32) -> (i32, i32) {
    %c0_i32 = arith.constant 0 : i32
    %c0_i32_0 = arith.constant 0 : i32
    %c0_i32_1 = arith.constant 0 : i32
    return %c0_i32, %c0_i32_0 : i32, i32
  }
  func.func @transform_3(%arg0: i32) -> (i32, i32, i32) {
    %c0_i32 = arith.constant 0 : i32
    %c0_i32_0 = arith.constant 0 : i32
    %c0_i32_1 = arith.constant 0 : i32
    %c0_i32_2 = arith.constant 0 : i32
    return %c0_i32, %c0_i32_0, %c0_i32_1 : i32, i32, i32
  }
  func.func @transform_4(%arg0: i32) -> (i32, i32, i32) {
    %c0_i32 = arith.constant 0 : i32
    %c0_i32_0 = arith.constant 0 : i32
    %c0_i32_1 = arith.constant 0 : i32
    %c0_i32_2 = arith.constant 0 : i32
    return %c0_i32, %c0_i32_0, %c0_i32_1 : i32, i32, i32
  }
  func.func @transform_5(%arg0: i32) -> (i32, i32, i32) {
    %c0_i32 = arith.constant 0 : i32
    %c0_i32_0 = arith.constant 0 : i32
    %c0_i32_1 = arith.constant 0 : i32
    %c0_i32_2 = arith.constant 0 : i32
    return %c0_i32, %c0_i32_0, %c0_i32_1 : i32, i32, i32
  }
  func.func @transform_6(%arg0: i32) -> (i32, i32, i32) {
    %c0_i32 = arith.constant 0 : i32
    %c0_i32_0 = arith.constant 0 : i32
    %c0_i32_1 = arith.constant 0 : i32
    %c0_i32_2 = arith.constant 0 : i32
    return %c0_i32, %c0_i32_0, %c0_i32_1 : i32, i32, i32
  }
  func.func @transform_7(%arg0: i32) -> (i32, i32) {
    %c0_i32 = arith.constant 0 : i32
    %c0_i32_0 = arith.constant 0 : i32
    %c0_i32_1 = arith.constant 0 : i32
    return %c0_i32, %c0_i32_0 : i32, i32
  }
  func.func @transform_8(%arg0: i32) -> (i32, i32) {
    %c0_i32 = arith.constant 0 : i32
    %c0_i32_0 = arith.constant 0 : i32
    %c0_i32_1 = arith.constant 0 : i32
    return %c0_i32, %c0_i32_0 : i32, i32
  }
  func.func @transform_9(%arg0: i32) -> (i32, i32) {
    %c0_i32 = arith.constant 0 : i32
    %c0_i32_0 = arith.constant 0 : i32
    %c0_i32_1 = arith.constant 0 : i32
    return %c0_i32, %c0_i32_0 : i32, i32
  }
  func.func @transform_10(%arg0: i32) -> (i32, i32) {
    %c0_i32 = arith.constant 0 : i32
    %c0_i32_0 = arith.constant 0 : i32
    %c0_i32_1 = arith.constant 0 : i32
    return %c0_i32, %c0_i32_0 : i32, i32
  }
  func.func @transform_11(%arg0: i32) -> (i32, i32) {
    %c0_i32 = arith.constant 0 : i32
    %c0_i32_0 = arith.constant 0 : i32
    return %c0_i32, %arg0 : i32, i32
  }
}

</mosaic_0001>

<bundles_post_ra>
// kernel: resnet_forward.1
= control target key start
LH: loop header
LB: loop body
LE: loop exit
PB: predicated region body
PF: predicated region fallthrough
CT: control target
= control target key end

     0   :  { %s2217_s0 = inlined_call_operand.vmem [shape: bf16[16,256], index: 0, kind: input, shape index: {}]   ;;  %s2218_s1 = inlined_call_operand.vmem [shape: bf16[32,16], index: 1, kind: input, shape index: {}]   ;;  %s2219_s2 = inlined_call_operand.vmem [shape: f32[32,1], index: 2, kind: input, shape index: {}]   ;;  %s2220_s3 = inlined_call_operand.vmem [shape: bf16[3,64,32], index: 3, kind: input, shape index: {}]   ;;  %s2221_s4 = inlined_call_operand.vmem [shape: f32[3,64,1], index: 4, kind: input, shape index: {}]   ;;  %s2222_s5 = inlined_call_operand.vmem [shape: bf16[3,32,64], index: 5, kind: input, shape index: {}]   ;;  %s2223_s6 = inlined_call_operand.vmem [shape: f32[3,32,1], index: 6, kind: input, shape index: {}]   ;;  %s2224_s7 = inlined_call_operand.vmem [shape: f32[32,1], index: 7, kind: input, shape index: {}]   ;;  %s2225_s8 = inlined_call_operand.vmem [shape: f32[32,1], index: 8, kind: input, shape index: {}]   ;;  %s2226_s9 = inlined_call_operand.vmem [shape: f32[32,1], index: 9, kind: input, shape index: {}]   ;;  %s2227_s10 = inlined_call_operand.<no memory space> [shape: f32[1,1], index: 10, kind: input, shape index: {}]   ;;  %s2228_s11 = inlined_call_operand.hbm [shape: f32[1,256], index: 11, kind: output, shape index: {}]  }
   0x1   :  { %v16_v0 = vstv %s2227_s10 }
   0x2   :  { %17 = vst [vmem:[#allocation2] sm:$0x1] %v16_v0 }
   0x3   :  { %18 = vsyncpa [#allocation5], 0 }
   0x4   :  { %20 = vsyncpa [#allocation5 + $0x1], 0  ;;  %s1828_s19 = smov 0   ;;  %s1830_s20 = smov 0  }
   0x5   :  { %s1832_s21 = smov 0   ;;  %s1834_s22 = smov 0  }
   0x6 LB: > { %s1461_s10 = sadd.s32 4294967295, %s1762_s22   ;;  %s1462_s23 = sadd.s32 4294967294, %s1762_s22   ;;  %s1762_s22 = sphi %s1834_s22, %s2234_s22   ;;  %s1758_s21 = sphi %s1832_s21, %s2233_s21   ;;  %s1754_s20 = sphi %s1830_s20, %s2232_s20   ;;  %s1750_s19 = sphi %s1828_s19, %s2231_s19  }
   0x7   : > { %s1851_s24 = sadd.s32 1, %s1762_s22   ;;  %s33_s25 = sadd.s32 1, %s1758_s21 }
   0x8   : > { %s30_s26 = ssub.s32 %s1762_s22, %s1851_s24  ;;  %p40_p0 = scmp.ne.s32.totalorder %s1758_s21, %s1754_s20 }
   0x9   : > { %p31_p1 = scmp.eq.s32.totalorder %s30_s26, 0  ;;  %p41_p2 = scmp.eq.s32.totalorder %s1762_s22, 0 }
   0xa   : > { %p280_p3 = scmp.eq.s32.totalorder %s1461_s10, 1  ;;  %p285_p4 = scmp.ne.s32.totalorder %s1754_s20, %s1750_s19 }
   0xb   : > { %s1864_s27 = scalar_select %p31_p1, %s1758_s21, %s33_s25  }
   0xc   : > { %p42_p5 = por %p41_p2, %p40_p0  ;;  %p1866_p6 = por %p280_p3, %p40_p0 }
   0xd   : > { %p286_p7 = scmp.eq.s32.totalorder %s1462_s23, 1  ;;  %p1464_p9 = scmp.ge.s32.totalorder %s1762_s22, 2 }
   0xf   : > { %p1870_p8 = por %p286_p7, %p285_p4  ;;  %332 = sbr.rel (%p1464_p9) target bundleno = 26 (0x1a), region = 56 }
  0x14   : > { %335 = sbr.rel (!%p42_p5) target bundleno = 26 (0x1a), region = 60  ;;  %s337_s30 = sand.u32 (%p42_p5), 1, %s1758_s21  }
  0x15   : > { %s1466_s12 = sshll.u32 (%p42_p5), %s1762_s22, 2  ;;  %s1465_s13 = sshll.u32 (%p42_p5), %s337_s30, 3 }
  0x16   : > { %s341_s16 = scalar_lea.vmem (%p42_p5), %s2217_s0, %s1466_s12  ;;  %s339_s17 = scalar_lea.vmem (%p42_p5), [#allocation3], %s1465_s13 }
  0x17   : > { %v358_v1 = vld [vmem:[%s341_s16] sm:$0xf] (%p42_p5)  ;;  %v360_v2 = vld [vmem:[%s341_s16 + $0x8] sm:$0xf] (%p42_p5) }
  0x18   : > { %359 = vst [vmem:[%s339_s17] sm:$0xf] (%p42_p5), %v358_v1 }
  0x19   : > { %361 = vst [vmem:[%s339_s17 + $0x4] sm:$0xf] %v360_v2 }
  0x1a PF: > { %p1467_p10 = scmp.ge.s32.totalorder %s1762_s22, 1  ;;  %p388_p11 = scmp.lt.s32.totalorder %s1762_s22, 3 }
  0x1c   : > { %p389_p12 = pnand %p1467_p10, %p388_p11 }
  0x1d   : > { %s1891_s30 = sand.u32 (!%p389_p12), 1, %s1754_s20   ;;  %s1397_s16 = scalar_lea.hbm (!%p389_p12), %s2228_s11, %s1461_s10 }
  0x1e   : > { %392 = sbr.rel (%p389_p12) target bundleno = 1563 (0x61b), region = 101  ;;  %s1468_s12 = sshll.u32 (!%p389_p12), %s1891_s30, 3 }
  0x1f   : > { %s397_s13 = scalar_lea.vmem (!%p389_p12), [#allocation3], %s1468_s12  ;;  %s432_s17 = scalar_lea.vmem (!%p389_p12), [#allocation4], %s1891_s30 }
  0x20   : > { %s1399_s18 = sshll.u32 (!%p389_p12), %s432_s17, 4  ;;  %s1401_s23 = sshll.u32 (!%p389_p12), %s1397_s16, 4  ;;  %s1400_s18 = int_to_ptr.vmem [resolvable:$true] %s1399_s18  ;;  %s1402_s23 = int_to_ptr.hbm [resolvable:$true] %s1401_s23 }
  0x21   : > { %s1389_s25 = scalar_lea.sflag (!%p389_p12), [#allocation5], %s1891_s30  ;;  %s1714_s26 = sshra.s32 (!%p389_p12), %s1402_s23, 4  ;;  %s1715_s26 = int_to_ptr.hbm [resolvable:$true] %s1714_s26 }
  0x22   : > { %s1716_s12 = scalar_lea.hbm (!%p389_p12), %s1715_s26, 1  ;;  %s1720_s14 = scalar_lea.hbm (!%p389_p12), %s2228_s11, 2 }
  0x23   : > { %v442_v3 = vld [vmem:[%s2219_s2 + $0x10] sm:$0xff]  ;;  %v440_v4 = vld [vmem:[%s2219_s2] sm:$0xff]  ;;  %v1764_v5 = vmov 0   ;;  %v1624_v8 = vld [vmem:[%s2218_s1 + $0x8] sm:$0xff]  ;;  %vm480_vm0 = vcmask 130048   ;;  %vm627_vm4 = vcmask 261120   ;;  %p1717_p13 = scmp.ne.s32.totalorder %s1715_s26, %s1716_s12  ;;  %p1721_p2 = scmp.lt.s32.totalorder %s1715_s26, %s2228_s11 }
  0x24   : > { %1690 = vset.pattern.permute.xlu1 %v1764_v5  ;;  %1689 = vset.pattern.permute.xlu0 %v1764_v5  ;;  %v1625_v6 = vld [vmem:[%s397_s13] sm:$0xff]  ;;  %v443_v9 = vld [vmem:[%s2219_s2 + $0x18] sm:$0xff]  ;;  %v1379_v43 = vld [vmem:[#allocation2] sm:$0x1]  ;;  %vm719_vm5 = vcmask 523264   ;;  %p1722_p3 = scmp.lt.s32.totalorder %s1720_s14, %s1716_s12 }
  0x25   : > { %456 = vperm.xlu1 %1690, %v442_v3   ;;  %446 = vperm.xlu0 %1689, %v440_v4   ;;  %v1623_v7 = vld [vmem:[%s2218_s1] sm:$0xff]  ;;  %v441_v10 = vld [vmem:[%s2219_s2 + $0x8] sm:$0xff]  ;;  %v562_v14 = vld [vmem:[%s2221_s4 + $0x18] sm:$0xff]  ;;  %p1718_p0 = pnand %p1717_p13, %p1866_p6 }
  0x26   : > { %1691 = vset.pattern.permute.xlu2 %v1764_v5  ;;  %494 = vmatpush.bf16.msra.mxu0 %v1625_v6  ;;  %v564_v11 = vld [vmem:[%s2221_s4 + $0x28] sm:$0xff]  ;;  %v563_v12 = vld [vmem:[%s2221_s4 + $0x20] sm:$0xff]  ;;  %v1527_v17 = vld [vmem:[%s2221_s4 + $0x70] sm:$0xff]  ;;  %p1723_p4 = por %p1722_p3, %p1721_p2 }
  0x27   : > { %1644 = vmatpush.bf16.msra.mxu3 %v1625_v6  ;;  %v559_v13 = vld [vmem:[%s2221_s4] sm:$0xff]  ;;  %v686_v15 = vld [vmem:[%s2223_s6 + $0x8] sm:$0xff]  ;;  %v688_v18 = vld [vmem:[%s2223_s6 + $0x18] sm:$0xff]  ;;  %p1719_p1 = pneg %p1718_p0 }
  0x28   : > { %v685_v16 = vld [vmem:[%s2223_s6] sm:$0xff]  ;;  %v1526_v19 = vld [vmem:[%s2221_s4 + $0x68] sm:$0xff]  ;;  %v1524_v22 = vld [vmem:[%s2221_s4 + $0x58] sm:$0xff] }
  0x29   : > { %1481 = vmatmul.msk.bf16.vlgmr.msra.gmra.mxu0 %vm480_vm0, %v1623_v7  ;;  %v1525_v20 = vld [vmem:[%s2221_s4 + $0x60] sm:$0xff]  ;;  %v1554_v23 = vld [vmem:[%s2223_s6 + $0x28] sm:$0xff]  ;;  %v1581_v25 = vld [vmem:[%s2221_s4 + $0xb0] sm:$0xff]  ;;  %p1724_p5 = pnand %p1723_p4, %p1719_p1 }
  0x2a   : > { %1482 = vmatmul.msk.bf16.vlgmr.msra.gmra.mxu3 %vm480_vm0, %v1624_v8  ;;  %v1521_v21 = vld [vmem:[%s2221_s4 + $0x40] sm:$0xff]  ;;  %v1556_v26 = vld [vmem:[%s2223_s6 + $0x38] sm:$0xff]  ;;  %v1580_v27 = vld [vmem:[%s2221_s4 + $0xa8] sm:$0xff] }
  0x2b   : > { %v1553_v24 = vld [vmem:[%s2223_s6 + $0x20] sm:$0xff]  ;;  %v1578_v30 = vld [vmem:[%s2221_s4 + $0x98] sm:$0xff]  ;;  %v1608_v31 = vld [vmem:[%s2223_s6 + $0x48] sm:$0xff] }
  0x2c   : > { %v1579_v28 = vld [vmem:[%s2221_s4 + $0xa0] sm:$0xff]  ;;  %v1610_v34 = vld [vmem:[%s2223_s6 + $0x58] sm:$0xff]  ;;  %v1241_v36 = vld [vmem:[%s2224_s7 + $0x10] sm:$0xff] }
  0x2d   : > { %461 = vperm.xlu1 %1690, %v443_v9   ;;  %451 = vperm.xlu0 %1689, %v441_v10   ;;  %v1575_v29 = vld [vmem:[%s2221_s4 + $0x80] sm:$0xff]  ;;  %v1245_v37 = vld [vmem:[%s2225_s8 + $0x10] sm:$0xff]  ;;  %v1242_v38 = vld [vmem:[%s2224_s7 + $0x18] sm:$0xff] }
  0x2e   : > { %v1607_v32 = vld [vmem:[%s2223_s6 + $0x40] sm:$0xff]  ;;  %v1343_v39 = vld [vmem:[%s2226_s9 + $0x8] sm:$0xff]  ;;  %v1345_v44 = vld [vmem:[%s2226_s9 + $0x18] sm:$0xff] }
  0x2f   : > { %v1239_v33 = vld [vmem:[%s2224_s7] sm:$0xff]  ;;  %v565_v47 = vld [vmem:[%s2221_s4 + $0x30] sm:$0xff]  ;;  %v566_v56 = vld [vmem:[%s2221_s4 + $0x38] sm:$0xff] }
  0x30   : > { %v1243_v35 = vld [vmem:[%s2225_s8] sm:$0xff]  ;;  %599 = vperm.xlu2 %1691, %v565_v47   ;;  %v561_v62 = vld [vmem:[%s2221_s4 + $0x10] sm:$0xff]  ;;  %v560_v3 = vld [vmem:[%s2221_s4 + $0x8] sm:$0xff] }
  0x31   : > { %v1342_v40 = vld [vmem:[%s2226_s9] sm:$0xff]  ;;  %v1609_v47 = vld [vmem:[%s2223_s6 + $0x50] sm:$0xff] }
  0x35   : > { %594 = vperm.xlu1 %1690, %v564_v11   ;;  %589 = vperm.xlu0 %1689, %v563_v12  }
  0x38   : > { %604 = vperm.xlu2 %1691, %v566_v56   ;;  %v1344_v56 = vld [vmem:[%s2226_s9 + $0x10] sm:$0xff] }
  0x3d   : > { %569 = vperm.xlu1 %1690, %v559_v13   ;;  %584 = vperm.xlu0 %1689, %v562_v14   ;;  %v687_v13 = vld [vmem:[%s2223_s6 + $0x10] sm:$0xff] }
  0x40   : > { %579 = vperm.xlu2 %1691, %v561_v62  }
  0x45   : > { %696 = vperm.xlu1 %1690, %v686_v15   ;;  %691 = vperm.xlu0 %1689, %v685_v16  }
  0x48   : > { %574 = vperm.xlu2 %1691, %v560_v3  }
  0x4d   : > { %844 = vperm.xlu1 %1690, %v1527_v17   ;;  %706 = vperm.xlu0 %1689, %v688_v18  }
  0x50   : > { %701 = vperm.xlu2 %1691, %v687_v13  }
  0x55   : > { %839 = vperm.xlu1 %1690, %v1526_v19   ;;  %834 = vperm.xlu0 %1689, %v1525_v20   ;;  %v1528_v19 = vld [vmem:[%s2221_s4 + $0x78] sm:$0xff] }
  0x58   : > { %849 = vperm.xlu2 %1691, %v1528_v19  }
  0x5d   : > { %814 = vperm.xlu1 %1690, %v1521_v21   ;;  %829 = vperm.xlu0 %1689, %v1524_v22  }
  0x65   : > { %942 = vperm.xlu1 %1690, %v1554_v23   ;;  %937 = vperm.xlu0 %1689, %v1553_v24   ;;  %v1523_v24 = vld [vmem:[%s2221_s4 + $0x50] sm:$0xff] }
  0x66   : > { %824 = vperm.xlu2 %1691, %v1523_v24  }
  0x6d   : > { %1089 = vperm.xlu1 %1690, %v1581_v25   ;;  %952 = vperm.xlu0 %1689, %v1556_v26  }
  0x75   : > { %1084 = vperm.xlu1 %1690, %v1580_v27   ;;  %1079 = vperm.xlu0 %1689, %v1579_v28   ;;  %v1522_v27 = vld [vmem:[%s2221_s4 + $0x48] sm:$0xff] }
  0x76   : > { %819 = vperm.xlu2 %1691, %v1522_v27  }
  0x7d   : > { %1059 = vperm.xlu1 %1690, %v1575_v29   ;;  %1074 = vperm.xlu0 %1689, %v1578_v30  }
  0x85   : > { %1187 = vperm.xlu1 %1690, %v1608_v31   ;;  %1182 = vperm.xlu0 %1689, %v1607_v32   ;;  %v1555_v32 = vld [vmem:[%s2223_s6 + $0x30] sm:$0xff] }
  0x86   : > { %947 = vperm.xlu2 %1691, %v1555_v32  }
  0x8d   : > { %1292 = vperm.xlu1 %1690, %v1239_v33   ;;  %1197 = vperm.xlu0 %1689, %v1610_v34  }
  0x95   : > { %1316 = vperm.xlu1 %1690, %v1243_v35   ;;  %1302 = vperm.xlu0 %1689, %v1241_v36  }
  0x97   : > { %v447_v41 = vpop.permute.xlu0 %446  ;;  %v457_v45 = vpop.permute.xlu1 %456 }
  0x9d   : > { %1326 = vperm.xlu1 %1690, %v1245_v37   ;;  %1307 = vperm.xlu0 %1689, %v1242_v38   ;;  %v1582_v38 = vld [vmem:[%s2221_s4 + $0xb8] sm:$0xff] }
  0x9e   : > { %1094 = vperm.xlu2 %1691, %v1582_v38  }
  0x9f   : > { %v452_v48 = vpop.permute.xlu0 %451  ;;  %v462_v54 = vpop.permute.xlu1 %461 }
  0xa5   : > { %1353 = vperm.xlu1 %1690, %v1343_v39   ;;  %1348 = vperm.xlu0 %1689, %v1342_v40  }
  0xa6   : > { %v496_v42 = vpop.f32.mrf.mxu0 }
  0xa7   : > { %v2002_v50 = vadd.f32 %v496_v42, %v447_v41  ;;  %v590_v3 = vpop.permute.xlu0 %589 }
  0xad   : > { %1382 = vperm.xlu1 %1690, %v1379_v43   ;;  %1363 = vperm.xlu0 %1689, %v1345_v44   ;;  %v501_v46 = vpop.f32.mrf.mxu3  ;;  %v1626_v43 = vld [vmem:[%s2220_s3] sm:$0xff]  ;;  %v1577_v44 = vld [vmem:[%s2221_s4 + $0x90] sm:$0xff] }
  0xae   : > { %v498_v49 = vpop.f32.mrf.mxu0  ;;  %v2008_v53 = vadd.f32 %v501_v46, %v457_v45  ;;  %1069 = vperm.xlu2 %1691, %v1577_v44   ;;  %v1576_v45 = vld [vmem:[%s2221_s4 + $0x88] sm:$0xff] }
  0xaf   : > { %v2004_v51 = vadd.f32 %v498_v49, %v452_v48  ;;  %v1627_v46 = vld [vmem:[%s2220_s3 + $0x8] sm:$0xff]  ;;  %v1628_v49 = vld [vmem:[%s2220_s3 + $0x10] sm:$0xff]  ;;  %v585_v13 = vpop.permute.xlu0 %584 }
  0xb0   : > { %v1240_v48 = vld [vmem:[%s2224_s7 + $0x8] sm:$0xff] }
  0xb1   : > { %v506_v52 = vadd.f32 %v2004_v51, %v2002_v50 }
  0xb3   : > { %v507_v58 = vadd.f32 %v506_v52, %v2008_v53  ;;  %v1244_v52 = vld [vmem:[%s2225_s8 + $0x8] sm:$0xff] }
  0xb5   : > { %v503_v55 = vpop.f32.mrf.mxu3 }
  0xb6   : > { %v2013_v57 = vadd.f32 %v503_v55, %v462_v54  ;;  %1064 = vperm.xlu2 %1691, %v1576_v45   ;;  %v1246_v54 = vld [vmem:[%s2225_s8 + $0x18] sm:$0xff] }
  0xb7   : > { %v1629_v55 = vld [vmem:[%s2220_s3 + $0x18] sm:$0xff] }
  0xb8   : > { %v508_v59 = vadd.f32 %v507_v58, %v2013_v57 }
  0xba   : > { %v509_v60 = vrot.slane %v508_v59, 4 }
  0xbc   : > { %v510_v61 = vadd.f32 %v509_v60, %v508_v59 }
  0xbe   : > { %v511_v63 = vrot.slane %v510_v61, 2  ;;  %1192 = vperm.xlu2 %1691, %v1609_v47  }
  0xc0   : > { %v512_v0 = vadd.f32 %v511_v63, %v510_v61  ;;  %v600_v63 = vpop.permute.xlu2 %599 }
  0xc2   : > { %v513_v1 = vrot.slane %v512_v0, 1 }
  0xc4   : > { %v514_v2 = vadd.f32 %v513_v1, %v512_v0 }
  0xc6   : > { %v515_v4 = vmul.f32 0.03125, %v514_v2  ;;  %1297 = vperm.xlu2 %1691, %v1240_v48  }
  0xc8   : > { %v516_v5 = vsub.f32 %v2002_v50, %v515_v4  ;;  %v517_v6 = vsub.f32 %v2004_v51, %v515_v4  ;;  %v518_v7 = vsub.f32 %v2008_v53, %v515_v4  ;;  %v519_v8 = vsub.f32 %v2013_v57, %v515_v4  ;;  %v605_v1 = vpop.permute.xlu2 %604 }
  0xca   : > { %v520_v9 = vmul.f32 %v516_v5, %v516_v5  ;;  %v521_v10 = vmul.f32 %v517_v6, %v517_v6  ;;  %v522_v11 = vmul.f32 %v518_v7, %v518_v7  ;;  %v523_v14 = vmul.f32 %v519_v8, %v519_v8 }
  0xcc   : > { %v524_v12 = vadd.f32 %v521_v10, %v520_v9 }
  0xce   : > { %v525_v15 = vadd.f32 %v524_v12, %v522_v11  ;;  %1321 = vperm.xlu2 %1691, %v1244_v52  }
  0xd0   : > { %v526_v16 = vadd.f32 %v525_v15, %v523_v14  ;;  %v580_v4 = vpop.permute.xlu2 %579 }
  0xd2   : > { %v527_v17 = vrot.slane %v526_v16, 4 }
  0xd4   : > { %v528_v18 = vadd.f32 %v527_v17, %v526_v16 }
  0xd6   : > { %v529_v20 = vrot.slane %v528_v18, 2  ;;  %1331 = vperm.xlu2 %1691, %v1246_v54  }
  0xd8   : > { %v530_v21 = vadd.f32 %v529_v20, %v528_v18  ;;  %v575_v19 = vpop.permute.xlu2 %574 }
  0xda   : > { %v531_v22 = vrot.slane %v530_v21, 1 }
  0xdc   : > { %v532_v23 = vadd.f32 %v531_v22, %v530_v21 }
  0xde   : > { %v533_v25 = vmul.f32 0.03125, %v532_v23  ;;  %1358 = vperm.xlu2 %1691, %v1344_v56  }
  0xe0   : > { %v534_v26 = vadd.f32 1e-05, %v533_v25 }
  0xe2   : > { %1692 = vrsqrt.f32 %v534_v26  ;;  %vm541_vm2 = vweird.f32 %v534_v26 }
  0xe8   : > { %v1693_v28 = vpop.eup %1692 }
  0xe9   : > { %v536_v29 = vmul.f32 %v1693_v28, %v534_v26  ;;  %vm542_vm1 = vweird.f32 %v1693_v28 }
  0xea   : > { %vm543_vm3 = vmor %vm541_vm2, %vm542_vm1 }
  0xeb   : > { %v537_v30 = vmul.f32 %v1693_v28, %v536_v29 }
  0xed   : > { %v538_v31 = vmul.f32 0.5, %v537_v30  ;;  %v1630_v30 = vld [vmem:[%s2222_s5] sm:$0xff] }
  0xef   : > { %v539_v33 = vsub.f32 1.5, %v538_v31  ;;  %v1631_v31 = vld [vmem:[%s2222_s5 + $0x8] sm:$0xff] }
  0xf1   : > { %v540_v34 = vmul.f32 %v1693_v28, %v539_v33  ;;  %v692_v33 = vpop.permute.xlu0 %691 }
  0xf3   : > { %v544_v35 = vsel %vm543_vm3, %v1693_v28, %v540_v34 }
  0xf4   : > { %v547_v36 = vmul.f32 %v544_v35, %v518_v7  ;;  %v548_v37 = vmul.f32 %v544_v35, %v519_v8  ;;  %v545_v40 = vmul.f32 %v544_v35, %v516_v5  ;;  %v546_v41 = vmul.f32 %v544_v35, %v517_v6  ;;  %v595_v6 = vpop.permute.xlu1 %594 }
  0xf6   : > { %v550_v39 = vpack.c.bf16 %v548_v37, %v547_v36  ;;  %v549_v42 = vpack.c.bf16 %v546_v41, %v545_v40 }
  0xf8   : > { %646 = vmatpush.bf16.msra.mxu1 %v550_v39  ;;  %v702_v39 = vpop.permute.xlu2 %701 }
  0xf9   : > { %v707_v44 = vpop.permute.xlu0 %706 }
  0xfc   : > { %647 = vmatpush.bf16.msra.mxu1 %v549_v42  ;;  %v570_v23 = vpop.permute.xlu1 %569 }
  0xff   : > { %1499 = vmatmul.msk.bf16.vlgmr.msra.gmra.mxu1 %vm627_vm4, %v1626_v43 }
 0x104   : > { %v697_v36 = vpop.permute.xlu1 %696 }
 0x10f   : > { %1500 = vmatmul.msk.bf16.gmra.mxu1 %vm627_vm4, %v1627_v46 }
 0x11f   : > { %1501 = vmatmul.msk.bf16.gmra.mxu1 %vm627_vm4, %v1628_v49 }
 0x12f   : > { %1502 = vmatmul.msk.bf16.gmra.mxu1 %vm627_vm4, %v1629_v55 }
 0x17c   : > { %v649_v58 = vpop.f32.mrf.mxu1 }
 0x17d   : > { %v650_v24 = vadd.f32 %v649_v58, %v570_v23 }
 0x17f   : > { %v669_v28 = vmax.f32 %v650_v24, 0.0 }
 0x184   : > { %v651_v59 = vpop.f32.mrf.mxu1 }
 0x185   : > { %v652_v20 = vadd.f32 %v651_v59, %v575_v19 }
 0x187   : > { %v670_v26 = vmax.f32 %v652_v20, 0.0 }
 0x189   : > { %v677_v29 = vpack.c.bf16 %v670_v26, %v669_v28  ;;  %v1632_v26 = vld [vmem:[%s2220_s3 + $0x20] sm:$0xff]  ;;  %v1634_v28 = vld [vmem:[%s2220_s3 + $0x30] sm:$0xff] }
 0x18c   : > { %v654_v60 = vpop.f32.mrf.mxu1 }
 0x18d   : > { %v655_v17 = vadd.f32 %v654_v60, %v580_v4 }
 0x18f   : > { %v671_v25 = vmax.f32 %v655_v17, 0.0 }
 0x194   : > { %v656_v61 = vpop.f32.mrf.mxu1 }
 0x195   : > { %v657_v14 = vadd.f32 %v656_v61, %v585_v13 }
 0x197   : > { %v672_v21 = vmax.f32 %v657_v14, 0.0 }
 0x199   : > { %v678_v27 = vpack.c.bf16 %v672_v21, %v671_v25 }
 0x19c   : > { %v659_v62 = vpop.f32.mrf.mxu1 }
 0x19d   : > { %v660_v10 = vadd.f32 %v659_v62, %v590_v3 }
 0x19f   : > { %v673_v18 = vmax.f32 %v660_v10, 0.0 }
 0x1a4   : > { %v661_v0 = vpop.f32.mrf.mxu1 }
 0x1a5   : > { %v662_v8 = vadd.f32 %v661_v0, %v595_v6 }
 0x1a7   : > { %v674_v15 = vmax.f32 %v662_v8, 0.0 }
 0x1a9   : > { %v679_v22 = vpack.c.bf16 %v674_v15, %v673_v18 }
 0x1ac   : > { %v664_v2 = vpop.f32.mrf.mxu1 }
 0x1ad   : > { %v665_v5 = vadd.f32 %v664_v2, %v600_v63 }
 0x1af   : > { %v675_v11 = vmax.f32 %v665_v5, 0.0 }
 0x1b4   : > { %v666_v7 = vpop.f32.mrf.mxu1 }
 0x1b5   : > { %v667_v9 = vadd.f32 %v666_v7, %v605_v1 }
 0x1b7   : > { %v676_v12 = vmax.f32 %v667_v9, 0.0 }
 0x1b9   : > { %v680_v16 = vpack.c.bf16 %v676_v12, %v675_v11 }
 0x1bb   : > { %730 = vmatpush.bf16.msrb.mxu1 %v680_v16  ;;  %1645 = vmatpush.bf16.msra.mxu2 %v680_v16 }
 0x1bf   : > { %731 = vmatpush.bf16.msrb.mxu1 %v679_v22  ;;  %1646 = vmatpush.bf16.msra.mxu2 %v679_v22 }
 0x1c3   : > { %732 = vmatpush.bf16.msrb.mxu1 %v678_v27  ;;  %1647 = vmatpush.bf16.msra.mxu2 %v678_v27  ;;  %v1633_v27 = vld [vmem:[%s2220_s3 + $0x28] sm:$0xff] }
 0x1c7   : > { %733 = vmatpush.bf16.msrb.mxu1 %v677_v29  ;;  %1648 = vmatpush.bf16.msra.mxu2 %v677_v29  ;;  %v1635_v29 = vld [vmem:[%s2220_s3 + $0x38] sm:$0xff] }
 0x1ca   : > { %1511 = vmatmul.msk.bf16.vlgmr.msrb.gmra.mxu1 %vm719_vm5, %v1630_v30  ;;  %1512 = vmatmul.msk.bf16.vlgmr.msra.gmra.mxu2 %vm719_vm5, %v1631_v31 }
 0x247   : > { %v735_v32 = vpop.f32.mrf.mxu1 }
 0x248   : > { %v736_v35 = vadd.f32 %v735_v32, %v692_v33 }
 0x24a   : > { %v2091_v40 = vadd.f32 %v736_v35, %v2002_v50 }
 0x24d   : > { %v740_v34 = vpop.f32.mrf.mxu2 }
 0x24e   : > { %v741_v41 = vadd.f32 %v740_v34, %v702_v39  ;;  %v835_v39 = vpop.permute.xlu0 %834 }
 0x24f   : > { %v737_v37 = vpop.f32.mrf.mxu1 }
 0x250   : > { %v738_v38 = vadd.f32 %v737_v37, %v697_v36  ;;  %v2099_v46 = vadd.f32 %v741_v41, %v2008_v53  ;;  %v850_v36 = vpop.permute.xlu2 %849  ;;  %v845_v37 = vpop.permute.xlu1 %844 }
 0x252   : > { %v2094_v42 = vadd.f32 %v738_v38, %v2004_v51 }
 0x254   : > { %v749_v43 = vadd.f32 %v2094_v42, %v2091_v40 }
 0x255   : > { %v742_v45 = vpop.f32.mrf.mxu2 }
 0x256   : > { %v743_v47 = vadd.f32 %v742_v45, %v707_v44  ;;  %v750_v49 = vadd.f32 %v749_v43, %v2099_v46 }
 0x258   : > { %v2102_v48 = vadd.f32 %v743_v47, %v2013_v57  ;;  %v825_v41 = vpop.permute.xlu2 %824  ;;  %v840_v44 = vpop.permute.xlu1 %839 }
 0x25a   : > { %v751_v50 = vadd.f32 %v750_v49, %v2102_v48 }
 0x25c   : > { %v752_v52 = vrot.slane %v751_v50, 4 }
 0x25e   : > { %v753_v54 = vadd.f32 %v752_v52, %v751_v50 }
 0x260   : > { %v754_v51 = vrot.slane %v753_v54, 2 }
 0x262   : > { %v755_v55 = vadd.f32 %v754_v51, %v753_v54  ;;  %v830_v51 = vpop.permute.xlu0 %829 }
 0x264   : > { %v756_v56 = vrot.slane %v755_v55, 1 }
 0x266   : > { %v757_v58 = vadd.f32 %v756_v56, %v755_v55 }
 0x268   : > { %v758_v59 = vmul.f32 0.03125, %v757_v58 }
 0x26a   : > { %v759_v60 = vsub.f32 %v2091_v40, %v758_v59  ;;  %v760_v53 = vsub.f32 %v2094_v42, %v758_v59  ;;  %v761_v61 = vsub.f32 %v2099_v46, %v758_v59  ;;  %v762_v57 = vsub.f32 %v2102_v48, %v758_v59 }
 0x26c   : > { %v763_v62 = vmul.f32 %v759_v60, %v759_v60  ;;  %v764_v63 = vmul.f32 %v760_v53, %v760_v53  ;;  %v765_v0 = vmul.f32 %v761_v61, %v761_v61  ;;  %v766_v2 = vmul.f32 %v762_v57, %v762_v57 }
 0x26e   : > { %v767_v1 = vadd.f32 %v764_v63, %v763_v62  ;;  %v815_v63 = vpop.permute.xlu1 %814 }
 0x270   : > { %v768_v3 = vadd.f32 %v767_v1, %v765_v0 }
 0x272   : > { %v769_v4 = vadd.f32 %v768_v3, %v766_v2 }
 0x274   : > { %v770_v5 = vrot.slane %v769_v4, 4 }
 0x276   : > { %v771_v6 = vadd.f32 %v770_v5, %v769_v4 }
 0x278   : > { %v772_v7 = vrot.slane %v771_v6, 2 }
 0x27a   : > { %v773_v8 = vadd.f32 %v772_v7, %v771_v6  ;;  %v1636_v6 = vld [vmem:[%s2222_s5 + $0x10] sm:$0xff]  ;;  %v1637_v7 = vld [vmem:[%s2222_s5 + $0x18] sm:$0xff] }
 0x27c   : > { %v774_v9 = vrot.slane %v773_v8, 1 }
 0x27e   : > { %v775_v10 = vadd.f32 %v774_v9, %v773_v8 }
 0x280   : > { %v776_v11 = vmul.f32 0.03125, %v775_v10  ;;  %v938_v10 = vpop.permute.xlu0 %937 }
 0x282   : > { %v777_v12 = vadd.f32 1e-05, %v776_v11  ;;  %v943_v11 = vpop.permute.xlu1 %942 }
 0x284   : > { %1694 = vrsqrt.f32 %v777_v12  ;;  %vm784_vm7 = vweird.f32 %v777_v12 }
 0x28a   : > { %v1695_v13 = vpop.eup %1694 }
 0x28b   : > { %v779_v14 = vmul.f32 %v1695_v13, %v777_v12  ;;  %vm785_vm6 = vweird.f32 %v1695_v13 }
 0x28c   : > { %vm786_vm8 = vmor %vm784_vm7, %vm785_vm6 }
 0x28d   : > { %v780_v15 = vmul.f32 %v1695_v13, %v779_v14 }
 0x28f   : > { %v781_v16 = vmul.f32 0.5, %v780_v15 }
 0x291   : > { %v782_v17 = vsub.f32 1.5, %v781_v16 }
 0x293   : > { %v783_v18 = vmul.f32 %v1695_v13, %v782_v17 }
 0x295   : > { %v787_v19 = vsel %vm786_vm8, %v1695_v13, %v783_v18 }
 0x296   : > { %v790_v20 = vmul.f32 %v787_v19, %v761_v61  ;;  %v791_v21 = vmul.f32 %v787_v19, %v762_v57  ;;  %v788_v23 = vmul.f32 %v787_v19, %v759_v60  ;;  %v789_v24 = vmul.f32 %v787_v19, %v760_v53  ;;  %v820_v53 = vpop.permute.xlu2 %819 }
 0x298   : > { %v793_v22 = vpack.c.bf16 %v791_v21, %v790_v20  ;;  %v792_v25 = vpack.c.bf16 %v789_v24, %v788_v23  ;;  %v953_v20 = vpop.permute.xlu0 %952 }
 0x29a   : > { %890 = vmatpush.bf16.msrb.mxu3 %v793_v22 }
 0x29e   : > { %891 = vmatpush.bf16.msrb.mxu3 %v792_v25  ;;  %v948_v14 = vpop.permute.xlu2 %947 }
 0x2a1   : > { %1545 = vmatmul.msk.bf16.vlgmr.msrb.gmra.mxu3 %vm627_vm4, %v1632_v26 }
 0x2b1   : > { %1546 = vmatmul.msk.bf16.gmra.mxu3 %vm627_vm4, %v1633_v27 }
 0x2c1   : > { %1547 = vmatmul.msk.bf16.gmra.mxu3 %vm627_vm4, %v1634_v28 }
 0x2d1   : > { %1548 = vmatmul.msk.bf16.gmra.mxu3 %vm627_vm4, %v1635_v29 }
 0x324   : > { %v893_v30 = vpop.f32.mrf.mxu3 }
 0x325   : > { %v894_v0 = vadd.f32 %v893_v30, %v815_v63 }
 0x327   : > { %v913_v4 = vmax.f32 %v894_v0, 0.0 }
 0x32c   : > { %v895_v31 = vpop.f32.mrf.mxu3 }
 0x32d   : > { %v896_v61 = vadd.f32 %v895_v31, %v820_v53 }
 0x32f   : > { %v914_v2 = vmax.f32 %v896_v61, 0.0 }
 0x331   : > { %v921_v5 = vpack.c.bf16 %v914_v2, %v913_v4  ;;  %v1638_v2 = vld [vmem:[%s2220_s3 + $0x40] sm:$0xff]  ;;  %v1640_v4 = vld [vmem:[%s2220_s3 + $0x50] sm:$0xff] }
 0x334   : > { %v898_v32 = vpop.f32.mrf.mxu3 }
 0x335   : > { %v899_v59 = vadd.f32 %v898_v32, %v825_v41 }
 0x337   : > { %v915_v1 = vmax.f32 %v899_v59, 0.0 }
 0x33c   : > { %v900_v33 = vpop.f32.mrf.mxu3 }
 0x33d   : > { %v901_v55 = vadd.f32 %v900_v33, %v830_v51 }
 0x33f   : > { %v916_v57 = vmax.f32 %v901_v55, 0.0 }
 0x341   : > { %v922_v3 = vpack.c.bf16 %v916_v57, %v915_v1 }
 0x344   : > { %v903_v34 = vpop.f32.mrf.mxu3 }
 0x345   : > { %v904_v50 = vadd.f32 %v903_v34, %v835_v39 }
 0x347   : > { %v917_v60 = vmax.f32 %v904_v50, 0.0 }
 0x34c   : > { %v905_v35 = vpop.f32.mrf.mxu3 }
 0x34d   : > { %v906_v47 = vadd.f32 %v905_v35, %v840_v44 }
 0x34f   : > { %v918_v56 = vmax.f32 %v906_v47, 0.0 }
 0x351   : > { %v923_v62 = vpack.c.bf16 %v918_v56, %v917_v60 }
 0x354   : > { %v908_v38 = vpop.f32.mrf.mxu3 }
 0x355   : > { %v909_v43 = vadd.f32 %v908_v38, %v845_v37 }
 0x357   : > { %v919_v52 = vmax.f32 %v909_v43, 0.0 }
 0x35c   : > { %v910_v45 = vpop.f32.mrf.mxu3 }
 0x35d   : > { %v911_v49 = vadd.f32 %v910_v45, %v850_v36 }
 0x35f   : > { %v920_v54 = vmax.f32 %v911_v49, 0.0 }
 0x361   : > { %v924_v58 = vpack.c.bf16 %v920_v54, %v919_v52 }
 0x363   : > { %975 = vmatpush.bf16.msrb.mxu0 %v924_v58 }
 0x367   : > { %976 = vmatpush.bf16.msrb.mxu0 %v923_v62 }
 0x36b   : > { %977 = vmatpush.bf16.msrb.mxu0 %v922_v3  ;;  %v1639_v3 = vld [vmem:[%s2220_s3 + $0x48] sm:$0xff] }
 0x36f   : > { %978 = vmatpush.bf16.msrb.mxu0 %v921_v5  ;;  %v1641_v5 = vld [vmem:[%s2220_s3 + $0x58] sm:$0xff] }
 0x372   : > { %1565 = vmatmul.msk.bf16.vlgmr.msrb.gmra.mxu0 %vm719_vm5, %v1636_v6 }
 0x382   : > { %1566 = vmatmul.msk.bf16.gmra.mxu0 %vm719_vm5, %v1637_v7 }
 0x3ef   : > { %v980_v8 = vpop.f32.mrf.mxu0 }
 0x3f0   : > { %v981_v15 = vadd.f32 %v980_v8, %v938_v10 }
 0x3f2   : > { %v2138_v18 = vadd.f32 %v981_v15, %v2091_v40  ;;  %v1080_v15 = vpop.permute.xlu0 %1079 }
 0x3f7   : > { %v982_v9 = vpop.f32.mrf.mxu0 }
 0x3f8   : > { %v983_v13 = vadd.f32 %v982_v9, %v943_v11 }
 0x3fa   : > { %v2135_v17 = vadd.f32 %v983_v13, %v2094_v42  ;;  %v1090_v13 = vpop.permute.xlu1 %1089 }
 0x3fc   : > { %v994_v22 = vadd.f32 %v2135_v17, %v2138_v18 }
 0x3ff   : > { %v985_v12 = vpop.f32.mrf.mxu0 }
 0x400   : > { %v986_v16 = vadd.f32 %v985_v12, %v948_v14  ;;  %v1095_v12 = vpop.permute.xlu2 %1094 }
 0x402   : > { %v2141_v19 = vadd.f32 %v986_v16, %v2099_v46 }
 0x404   : > { %v995_v24 = vadd.f32 %v994_v22, %v2141_v19 }
 0x407   : > { %v987_v21 = vpop.f32.mrf.mxu0 }
 0x408   : > { %v988_v23 = vadd.f32 %v987_v21, %v953_v20  ;;  %v1070_v16 = vpop.permute.xlu2 %1069  ;;  %v1085_v21 = vpop.permute.xlu1 %1084 }
 0x40a   : > { %v2147_v25 = vadd.f32 %v988_v23, %v2102_v48 }
 0x40c   : > { %v996_v42 = vadd.f32 %v995_v24, %v2147_v25 }
 0x40e   : > { %v997_v26 = vrot.slane %v996_v42, 4 }
 0x410   : > { %v998_v27 = vadd.f32 %v997_v26, %v996_v42 }
 0x412   : > { %v999_v40 = vrot.slane %v998_v27, 2 }
 0x414   : > { %v1000_v28 = vadd.f32 %v999_v40, %v998_v27  ;;  %v1075_v40 = vpop.permute.xlu0 %1074 }
 0x416   : > { %v1001_v29 = vrot.slane %v1000_v28, 1 }
 0x418   : > { %v1002_v46 = vadd.f32 %v1001_v29, %v1000_v28 }
 0x41a   : > { %v1003_v30 = vmul.f32 0.03125, %v1002_v46 }
 0x41c   : > { %v1004_v31 = vsub.f32 %v2138_v18, %v1003_v30  ;;  %v1005_v32 = vsub.f32 %v2135_v17, %v1003_v30  ;;  %v1006_v33 = vsub.f32 %v2141_v19, %v1003_v30  ;;  %v1007_v34 = vsub.f32 %v2147_v25, %v1003_v30 }
 0x41e   : > { %v1008_v35 = vmul.f32 %v1004_v31, %v1004_v31  ;;  %v1009_v48 = vmul.f32 %v1005_v32, %v1005_v32  ;;  %v1010_v36 = vmul.f32 %v1006_v33, %v1006_v33  ;;  %v1011_v38 = vmul.f32 %v1007_v34, %v1007_v34 }
 0x420   : > { %v1012_v37 = vadd.f32 %v1009_v48, %v1008_v35  ;;  %v1060_v48 = vpop.permute.xlu1 %1059 }
 0x422   : > { %v1013_v39 = vadd.f32 %v1012_v37, %v1010_v36 }
 0x424   : > { %v1014_v41 = vadd.f32 %v1013_v39, %v1011_v38 }
 0x426   : > { %v1015_v43 = vrot.slane %v1014_v41, 4 }
 0x428   : > { %v1016_v44 = vadd.f32 %v1015_v43, %v1014_v41 }
 0x42a   : > { %v1017_v45 = vrot.slane %v1016_v44, 2 }
 0x42c   : > { %v1018_v47 = vadd.f32 %v1017_v45, %v1016_v44  ;;  %v1642_v44 = vld [vmem:[%s2222_s5 + $0x20] sm:$0xff]  ;;  %v1643_v45 = vld [vmem:[%s2222_s5 + $0x28] sm:$0xff] }
 0x42e   : > { %v1019_v49 = vrot.slane %v1018_v47, 1 }
 0x430   : > { %v1020_v50 = vadd.f32 %v1019_v49, %v1018_v47 }
 0x432   : > { %v1021_v52 = vmul.f32 0.03125, %v1020_v50  ;;  %v1183_v50 = vpop.permute.xlu0 %1182 }
 0x434   : > { %v1022_v54 = vadd.f32 1e-05, %v1021_v52  ;;  %v1188_v52 = vpop.permute.xlu1 %1187 }
 0x436   : > { %1696 = vrsqrt.f32 %v1022_v54  ;;  %vm1029_vm10 = vweird.f32 %v1022_v54 }
 0x43c   : > { %v1697_v51 = vpop.eup %1696 }
 0x43d   : > { %v1024_v55 = vmul.f32 %v1697_v51, %v1022_v54  ;;  %vm1030_vm9 = vweird.f32 %v1697_v51 }
 0x43e   : > { %vm1031_vm11 = vmor %vm1029_vm10, %vm1030_vm9 }
 0x43f   : > { %v1025_v56 = vmul.f32 %v1697_v51, %v1024_v55 }
 0x441   : > { %v1026_v58 = vmul.f32 0.5, %v1025_v56 }
 0x443   : > { %v1027_v59 = vsub.f32 1.5, %v1026_v58 }
 0x445   : > { %v1028_v60 = vmul.f32 %v1697_v51, %v1027_v59 }
 0x447   : > { %v1032_v53 = vsel %vm1031_vm11, %v1697_v51, %v1028_v60 }
 0x448   : > { %v1035_v61 = vmul.f32 %v1032_v53, %v1006_v33  ;;  %v1036_v57 = vmul.f32 %v1032_v53, %v1007_v34  ;;  %v1033_v63 = vmul.f32 %v1032_v53, %v1004_v31  ;;  %v1034_v0 = vmul.f32 %v1032_v53, %v1005_v32  ;;  %v1065_v32 = vpop.permute.xlu2 %1064 }
 0x44a   : > { %v1038_v62 = vpack.c.bf16 %v1036_v57, %v1035_v61  ;;  %v1037_v1 = vpack.c.bf16 %v1034_v0, %v1033_v63  ;;  %v1198_v61 = vpop.permute.xlu0 %1197 }
 0x44c   : > { %1135 = vmatpush.bf16.msrb.mxu2 %v1038_v62 }
 0x450   : > { %1136 = vmatpush.bf16.msrb.mxu2 %v1037_v1  ;;  %v1193_v55 = vpop.permute.xlu2 %1192 }
 0x453   : > { %1599 = vmatmul.msk.bf16.vlgmr.msrb.gmra.mxu2 %vm627_vm4, %v1638_v2 }
 0x463   : > { %1600 = vmatmul.msk.bf16.gmra.mxu2 %vm627_vm4, %v1639_v3 }
 0x473   : > { %1601 = vmatmul.msk.bf16.gmra.mxu2 %vm627_vm4, %v1640_v4 }
 0x483   : > { %1602 = vmatmul.msk.bf16.gmra.mxu2 %vm627_vm4, %v1641_v5 }
 0x4d6   : > { %v1138_v6 = vpop.f32.mrf.mxu2 }
 0x4d7   : > { %v1139_v36 = vadd.f32 %v1138_v6, %v1060_v48 }
 0x4d9   : > { %v1158_v41 = vmax.f32 %v1139_v36, 0.0 }
 0x4de   : > { %v1140_v7 = vpop.f32.mrf.mxu2 }
 0x4df   : > { %v1141_v33 = vadd.f32 %v1140_v7, %v1065_v32 }
 0x4e1   : > { %v1159_v38 = vmax.f32 %v1141_v33, 0.0 }
 0x4e3   : > { %v1166_v43 = vpack.c.bf16 %v1159_v38, %v1158_v41 }
 0x4e6   : > { %v1143_v8 = vpop.f32.mrf.mxu2 }
 0x4e7   : > { %v1144_v30 = vadd.f32 %v1143_v8, %v1070_v16 }
 0x4e9   : > { %v1160_v37 = vmax.f32 %v1144_v30, 0.0 }
 0x4ee   : > { %v1145_v9 = vpop.f32.mrf.mxu2 }
 0x4ef   : > { %v1146_v28 = vadd.f32 %v1145_v9, %v1075_v40  ;;  %v1298_v40 = vpop.permute.xlu2 %1297 }
 0x4f1   : > { %v1161_v34 = vmax.f32 %v1146_v28, 0.0 }
 0x4f3   : > { %v1167_v39 = vpack.c.bf16 %v1161_v34, %v1160_v37 }
 0x4f6   : > { %v1148_v10 = vpop.f32.mrf.mxu2 }
 0x4f7   : > { %v1149_v42 = vadd.f32 %v1148_v10, %v1080_v15 }
 0x4f9   : > { %v1162_v31 = vmax.f32 %v1149_v42, 0.0 }
 0x4fe   : > { %v1150_v11 = vpop.f32.mrf.mxu2 }
 0x4ff   : > { %v1151_v23 = vadd.f32 %v1150_v11, %v1085_v21 }
 0x501   : > { %v1163_v29 = vmax.f32 %v1151_v23, 0.0 }
 0x503   : > { %v1168_v35 = vpack.c.bf16 %v1163_v29, %v1162_v31  ;;  %v1303_v29 = vpop.permute.xlu0 %1302  ;;  %v1322_v31 = vpop.permute.xlu2 %1321 }
 0x506   : > { %v1153_v14 = vpop.f32.mrf.mxu2 }
 0x507   : > { %v1154_v20 = vadd.f32 %v1153_v14, %v1090_v13 }
 0x509   : > { %v1164_v26 = vmax.f32 %v1154_v20, 0.0 }
 0x50b   : > { %v1308_v33 = vpop.permute.xlu0 %1307  ;;  %v1332_v38 = vpop.permute.xlu2 %1331 }
 0x50e   : > { %v1155_v22 = vpop.f32.mrf.mxu2 }
 0x50f   : > { %v1156_v24 = vadd.f32 %v1155_v22, %v1095_v12 }
 0x511   : > { %v1165_v27 = vmax.f32 %v1156_v24, 0.0 }
 0x513   : > { %v1169_v46 = vpack.c.bf16 %v1165_v27, %v1164_v26  ;;  %v1293_v26 = vpop.permute.xlu1 %1292 }
 0x515   : > { %1220 = vmatpush.bf16.msra.mxu0 %v1169_v46 }
 0x519   : > { %1221 = vmatpush.bf16.msra.mxu0 %v1168_v35 }
 0x51b   : > { %v1317_v46 = vpop.permute.xlu1 %1316 }
 0x51d   : > { %1222 = vmatpush.bf16.msra.mxu0 %v1167_v39 }
 0x521   : > { %1223 = vmatpush.bf16.msra.mxu0 %v1166_v43 }
 0x523   : > { %v1327_v36 = vpop.permute.xlu1 %1326 }
 0x524   : > { %1619 = vmatmul.msk.bf16.vlgmr.msra.gmra.mxu0 %vm719_vm5, %v1642_v44 }
 0x534   : > { %1620 = vmatmul.msk.bf16.gmra.mxu0 %vm719_vm5, %v1643_v45 }
 0x5a1   : > { %v1225_v47 = vpop.f32.mrf.mxu0 }
 0x5a2   : > { %v1226_v56 = vadd.f32 %v1225_v47, %v1183_v50  ;;  %v1349_v47 = vpop.permute.xlu0 %1348 }
 0x5a4   : > { %v1235_v60 = vadd.f32 %v1226_v56, %v2138_v18 }
 0x5a9   : > { %v1227_v49 = vpop.f32.mrf.mxu0 }
 0x5aa   : > { %v1228_v51 = vadd.f32 %v1227_v49, %v1188_v52 }
 0x5ac   : > { %v1236_v59 = vadd.f32 %v1228_v51, %v2135_v17 }
 0x5ae   : > { %v1247_v62 = vadd.f32 %v1236_v59, %v1235_v60 }
 0x5b1   : > { %v1230_v54 = vpop.f32.mrf.mxu0 }
 0x5b2   : > { %v1231_v58 = vadd.f32 %v1230_v54, %v1193_v55 }
 0x5b4   : > { %v1237_v53 = vadd.f32 %v1231_v58, %v2141_v19 }
 0x5b6   : > { %v1248_v0 = vadd.f32 %v1247_v62, %v1237_v53 }
 0x5b9   : > { %v1232_v57 = vpop.f32.mrf.mxu0 }
 0x5ba   : > { %v1233_v63 = vadd.f32 %v1232_v57, %v1198_v61  ;;  %v1354_v61 = vpop.permute.xlu1 %1353 }
 0x5bc   : > { %v1238_v1 = vadd.f32 %v1233_v63, %v2147_v25 }
 0x5be   : > { %v1249_v2 = vadd.f32 %v1248_v0, %v1238_v1  ;;  %v1359_v0 = vpop.permute.xlu2 %1358 }
 0x5c0   : > { %v1250_v3 = vrot.slane %v1249_v2, 4 }
 0x5c2   : > { %v1251_v4 = vadd.f32 %v1250_v3, %v1249_v2  ;;  %v1364_v3 = vpop.permute.xlu0 %1363 }
 0x5c4   : > { %v1252_v5 = vrot.slane %v1251_v4, 2 }
 0x5c6   : > { %v1253_v6 = vadd.f32 %v1252_v5, %v1251_v4 }
 0x5c8   : > { %v1254_v7 = vrot.slane %v1253_v6, 1 }
 0x5ca   : > { %v1255_v8 = vadd.f32 %v1254_v7, %v1253_v6 }
 0x5cc   : > { %v1256_v9 = vmul.f32 0.03125, %v1255_v8 }
 0x5ce   : > { %v1257_v17 = vsub.f32 %v1235_v60, %v1256_v9  ;;  %v1258_v10 = vsub.f32 %v1236_v59, %v1256_v9  ;;  %v1259_v18 = vsub.f32 %v1237_v53, %v1256_v9  ;;  %v1260_v11 = vsub.f32 %v1238_v1, %v1256_v9 }
 0x5d0   : > { %v1261_v19 = vmul.f32 %v1257_v17, %v1257_v17  ;;  %v1262_v12 = vmul.f32 %v1258_v10, %v1258_v10  ;;  %v1263_v13 = vmul.f32 %v1259_v18, %v1259_v18  ;;  %v1264_v15 = vmul.f32 %v1260_v11, %v1260_v11 }
 0x5d2   : > { %v1265_v14 = vadd.f32 %v1262_v12, %v1261_v19 }
 0x5d4   : > { %v1266_v16 = vadd.f32 %v1265_v14, %v1263_v13 }
 0x5d6   : > { %v1267_v20 = vadd.f32 %v1266_v16, %v1264_v15 }
 0x5d8   : > { %v1268_v25 = vrot.slane %v1267_v20, 4 }
 0x5da   : > { %v1269_v21 = vadd.f32 %v1268_v25, %v1267_v20 }
 0x5dc   : > { %v1270_v22 = vrot.slane %v1269_v21, 2 }
 0x5de   : > { %v1271_v23 = vadd.f32 %v1270_v22, %v1269_v21 }
 0x5e0   : > { %v1272_v24 = vrot.slane %v1271_v23, 1 }
 0x5e2   : > { %v1273_v42 = vadd.f32 %v1272_v24, %v1271_v23 }
 0x5e4   : > { %v1274_v27 = vmul.f32 0.03125, %v1273_v42 }
 0x5e6   : > { %v1275_v28 = vadd.f32 1e-05, %v1274_v27 }
 0x5e8   : > { %1698 = vrsqrt.f32 %v1275_v28  ;;  %vm1282_vm13 = vweird.f32 %v1275_v28 }
 0x5ee   : > { %v1699_v30 = vpop.eup %1698 }
 0x5ef   : > { %v1277_v32 = vmul.f32 %v1699_v30, %v1275_v28  ;;  %vm1283_vm12 = vweird.f32 %v1699_v30 }
 0x5f0   : > { %vm1284_vm14 = vmor %vm1282_vm13, %vm1283_vm12 }
 0x5f1   : > { %v1278_v34 = vmul.f32 %v1699_v30, %v1277_v32 }
 0x5f3   : > { %v1279_v35 = vmul.f32 0.5, %v1278_v34 }
 0x5f5   : > { %v1280_v48 = vsub.f32 1.5, %v1279_v35 }
 0x5f7   : > { %v1281_v37 = vmul.f32 %v1699_v30, %v1280_v48 }
 0x5f9   : > { %v1285_v39 = vsel %vm1284_vm14, %v1699_v30, %v1281_v37 }
 0x5fa   : > { %v1286_v41 = vmul.f32 %v1285_v39, %v1257_v17  ;;  %v1287_v43 = vmul.f32 %v1285_v39, %v1258_v10  ;;  %v1288_v44 = vmul.f32 %v1285_v39, %v1259_v18  ;;  %v1289_v45 = vmul.f32 %v1285_v39, %v1260_v11  ;;  %v1383_v10 = vpop.permute.xlu1 %1382 }
 0x5fb   : > { %v1385_v11 = vperm.slane %v1383_v10, 0 }
 0x5fc   : > { %v1310_v49 = vmul.f32 %v1293_v26, %v1286_v41  ;;  %v1311_v50 = vmul.f32 %v1298_v40, %v1287_v43  ;;  %v1312_v52 = vmul.f32 %v1303_v29, %v1288_v44  ;;  %v1313_v54 = vmul.f32 %v1308_v33, %v1289_v45 }
 0x5fe   : > { %v1334_v51 = vadd.f32 %v1317_v46, %v1310_v49  ;;  %v1335_v55 = vadd.f32 %v1322_v31, %v1311_v50  ;;  %v1336_v56 = vadd.f32 %v1327_v36, %v1312_v52  ;;  %v1337_v58 = vadd.f32 %v1332_v38, %v1313_v54 }
 0x600   : > { %v1338_v59 = vmax.f32 %v1334_v51, 0.0  ;;  %v1339_v60 = vmax.f32 %v1335_v55, 0.0  ;;  %v1340_v53 = vmax.f32 %v1336_v56, 0.0  ;;  %v1341_v57 = vmax.f32 %v1337_v58, 0.0 }
 0x602   : > { %v1366_v62 = vmul.f32 %v1349_v47, %v1338_v59  ;;  %v1367_v63 = vmul.f32 %v1354_v61, %v1339_v60  ;;  %v1368_v1 = vmul.f32 %v1359_v0, %v1340_v53  ;;  %v1369_v4 = vmul.f32 %v1364_v3, %v1341_v57 }
 0x604   : > { %v1370_v2 = vadd.f32 %v1367_v63, %v1366_v62 }
 0x606   : > { %v1371_v5 = vadd.f32 %v1370_v2, %v1368_v1 }
 0x608   : > { %v1372_v6 = vadd.f32 %v1371_v5, %v1369_v4 }
 0x60a   : > { %v1373_v7 = vrot.slane %v1372_v6, 4 }
 0x60c   : > { %v1374_v8 = vadd.f32 %v1373_v7, %v1372_v6 }
 0x60e   : > { %v1375_v9 = vrot.slane %v1374_v8, 2 }
 0x610   : > { %v1376_v17 = vadd.f32 %v1375_v9, %v1374_v8 }
 0x612   : > { %v1377_v18 = vrot.slane %v1376_v17, 1 }
 0x614   : > { %v1378_v19 = vadd.f32 %v1377_v18, %v1376_v17 }
 0x616   : > { %v1386_v12 = vadd.f32 %v1385_v11, %v1378_v19 }
 0x618   : > { %1387 = vst [vmem:[%s432_s17] sm:$0x1] %v1386_v12 }
 0x619   : > { %1727 = shalt.err (!%p1724_p5)
}
 0x61a   : > { %1649 = dma.vmem_to_hbm [thread:$0]  (%p1866_p6), %s1400_s18, 16, %s1402_s23, %s1389_s25  }
 0x61b PF: > { %s1413_s30 = sand.u32 1, %s1750_s19   ;;  %p1652_p7 = pnand %p1464_p9, %p1870_p8 }
 0x61c   : > { %s1414_s17 = scalar_lea.sflag [#allocation5], %s1413_s30 }
 0x61d   : > { %p1653_p10 = pneg %p1652_p7 }
 0x61f   : > { %1745 = dma.done.wait (%p1653_p10), %s1414_s17, 16  }
 0x620   : > { %1747 = vsyncadd (%p1653_p10), %s1414_s17, 4294967280  ;;  %p23_p11 = scmp.ge.s32.totalorder %s1851_s24, 4   ;;  %s2231_s19 = smov %s1754_s20 }
 0x621   : > { %s2232_s20 = smov %s1758_s21  ;;  %s2233_s21 = smov %s1864_s27 }
 0x622   : > { %s2234_s22 = smov %s1851_s24  ;;  %25 = sbr.rel (!%p23_p11) target bundleno = 6 (0x6), region = 153 }
 0x627   :  { %1419 = vsyncpa [#allocation5], 1 }
 0x628   :  { %1421 = vsyncpa [#allocation5 + $0x1], 1 }

</bundles_post_ra>
